<compile_context>
chip_gen: v5e
topology: v5e:2x2
jax: 0.10.0
libtpu: 0.0.40
codegen_flags: <defaults>
</compile_context>

<pallas_src>
import jax
import jax.numpy as jnp
from jax.experimental import pallas as pl
from jax.experimental.pallas import tpu as pltpu

_LANES = 128      # TPU lane width (output slab / padded dims)
_SUBLANE = 16     # bf16 packs 16 rows per vreg -> keep batch tiles 16-aligned


def _round_up(n, m):
    return ((n + m - 1) // m) * m


def discriminator_kernel(x_ref,
                         w1_ref, b1_ref,
                         w2_ref, b2_ref,
                         w3_ref, b3_ref,
                         w4_ref, b4_ref,
                         out_ref):
    """One batch tile of the fused 4-layer MLP (all four matmuls on the MXU)."""
    # Cast to bf16 in-kernel instead of a separate XLA cast pass over x in HBM.
    x = x_ref[...].astype(jnp.bfloat16)                          # (TB, Din)

    # Layer 1: Linear(Din -> Hpad) + ReLU   (MXU, f32 accumulate; bias on f32)
    h = jnp.dot(x, w1_ref[...], preferred_element_type=jnp.float32)
    h = jnp.maximum(h + b1_ref[...], 0.0).astype(jnp.bfloat16)

    # Layer 2: Linear(Hpad -> 512) + ReLU
    h = jnp.dot(h, w2_ref[...], preferred_element_type=jnp.float32)
    h = jnp.maximum(h + b2_ref[...], 0.0).astype(jnp.bfloat16)

    # Layer 3: Linear(512 -> 256) + ReLU (bf16: feeds one more MXU pass)
    h = jnp.dot(h, w3_ref[...], preferred_element_type=jnp.float32)
    h = jnp.maximum(h + b3_ref[...], 0.0).astype(jnp.bfloat16)

    # Layer 4: Linear(256 -> 1) + Sigmoid.  w4 is zero-padded to (256, 128) so
    # this is a cheap extra MXU pass that natively yields a lane-dense
    # (TB, 128) slab; column 0 holds the real logit.
    logits = jnp.dot(h, w4_ref[...], preferred_element_type=jnp.float32)
    logits = logits + b4_ref[...]
    y = 1.0 / (1.0 + jnp.exp(-logits))                           # sigmoid
    out_ref[...] = y.astype(out_ref.dtype)


def _choose_batch_tile(batch, batch_tile):
    """Sublane-aligned batch tile; >= 2 grid steps whenever the batch allows."""
    batch_tile = max(_round_up(batch_tile, _SUBLANE), _SUBLANE)
    tb = min(batch_tile, _round_up(batch, _SUBLANE))
    # v7x has 2 TensorCores: the batch axis is the only parallel axis, so make
    # sure it has at least two tiles when B is big enough to split.
    if batch <= batch_tile and batch >= 2 * _SUBLANE:
        tb = _round_up((batch + 1) // 2, _SUBLANE)
    return tb


def discriminator_forward(x, kernel_params, *, batch_tile=512):
    """x: (B, input_dim) float. kernel_params: output of prepare_params()."""
    w1, b1, w2, b2, w3, b3, w4, b4 = kernel_params
    B, din = x.shape
    assert w1.shape[0] == din

    tb = _choose_batch_tile(B, batch_tile)
    grid = (pl.cdiv(B, tb),)   # ragged last tile: OOB reads unused, writes dropped

    # Weights/biases: one full-array block, same block index every step
    # -> DMA'd once, VMEM-resident for the whole batch loop.
    const_spec = lambda a: pl.BlockSpec(a.shape, lambda i: (0, 0))
    weight_specs = [const_spec(a) for a in kernel_params]

    h_pad = w1.shape[1]
    flops = 2 * B * (din * h_pad + h_pad * 512 + 512 * 256 + 256 * _LANES)
    bytes_accessed = int(
        x.size * x.dtype.itemsize
        + sum(a.size * a.dtype.itemsize for a in kernel_params)
        + B * _LANES * 2)
    cost = pl.CostEstimate(flops=int(flops), transcendentals=int(B * _LANES),
                           bytes_accessed=bytes_accessed)

    out = pl.pallas_call(
        discriminator_kernel,
        out_shape=jax.ShapeDtypeStruct((B, _LANES), jnp.bfloat16),
        grid=grid,
        in_specs=[pl.BlockSpec((tb, din), lambda i: (i, 0))] + weight_specs,
        out_specs=pl.BlockSpec((tb, _LANES), lambda i: (i, 0)),
        compiler_params=pltpu.CompilerParams(
            dimension_semantics=("parallel",)),   # shard batch tiles across TCs
        cost_estimate=cost,
    )(x, *kernel_params)

    # Only lane 0 of the slab is meaningful.
    return out[:, :1].astype(jnp.float32)


# --------------------------- parameters ------------------------------------

def init_linear(key, fan_in, fan_out):
    """PyTorch-style init U(-1/sqrt(fan_in), 1/sqrt(fan_in)); weight as (in, out)."""
    k_w, k_b = jax.random.split(key)
    bound = 1.0 / jnp.sqrt(fan_in)
    w = jax.random.uniform(k_w, (fan_in, fan_out), jnp.float32, -bound, bound)
    b = jax.random.uniform(k_b, (1, fan_out), jnp.float32, -bound, bound)
    return w, b


def make_params(key, input_dim, hidden_dim):
    k1, k2, k3, k4 = jax.random.split(key, 4)
    w1, b1 = init_linear(k1, input_dim, hidden_dim)
    w2, b2 = init_linear(k2, hidden_dim, 512)
    w3, b3 = init_linear(k3, 512, 256)
    w4, b4 = init_linear(k4, 256, 1)
    return (w1, b1, w2, b2, w3, b3, w4, b4)


def prepare_params(params):
    """Convert f32 (in, out)-layout params to the kernel layout:
       - hidden dim zero-padded to a multiple of 128 (numerically inert:
         ReLU(0) only ever multiplies zero rows of w2),
       - final layer zero-padded to 128 output lanes (padded columns produce
         sigmoid(0)=0.5 and are sliced away by the wrapper),
       - matmul weights cast to bf16, biases kept f32 (added on f32 accumulator)."""
    w1, b1, w2, b2, w3, b3, w4, b4 = params
    h = w1.shape[1]
    h_pad = _round_up(h, _LANES)
    if h_pad != h:
        w1 = jnp.pad(w1, ((0, 0), (0, h_pad - h)))
        b1 = jnp.pad(b1, ((0, 0), (0, h_pad - h)))
        w2 = jnp.pad(w2, ((0, h_pad - h), (0, 0)))
    w4 = jnp.pad(w4, ((0, 0), (0, _LANES - w4.shape[1])))   # (256,1) -> (256,128)
    b4 = jnp.pad(b4, ((0, 0), (0, _LANES - b4.shape[1])))   # (1,1)   -> (1,128)
    return (w1.astype(jnp.bfloat16), b1.astype(jnp.float32),
            w2.astype(jnp.bfloat16), b2.astype(jnp.float32),
            w3.astype(jnp.bfloat16), b3.astype(jnp.float32),
            w4.astype(jnp.bfloat16), b4.astype(jnp.float32))


def reference_forward(x, params):
    w1, b1, w2, b2, w3, b3, w4, b4 = params
    h = jnp.maximum(x @ w1 + b1, 0.0)
    h = jnp.maximum(h @ w2 + b2, 0.0)
    h = jnp.maximum(h @ w3 + b3, 0.0)
    return jax.nn.sigmoid(h @ w4 + b4)


# TODO(synk): torch.optim.Adam and save_model/load_model are training / file-IO
# utilities with no forward-pass Pallas equivalent; only forward() is kernelized.

if __name__ == "__main__":
    key = jax.random.PRNGKey(0)
    k_params, k_x = jax.random.split(key)

    batch, input_dim, hidden_dim = 32, 64, 32
    params = make_params(k_params, input_dim, hidden_dim)
    kernel_params = prepare_params(params)
    x = jax.random.normal(k_x, (batch, input_dim), jnp.float32)

    out = discriminator_forward(x, kernel_params)
    out = jax.block_until_ready(out)

    ref = reference_forward(x, params)
    assert out.shape == (batch, 1)
    # bf16 weights/activations vs f32 reference: loosened tolerance (expected).
    assert jnp.allclose(out, ref, atol=2e-2, rtol=0.0), (
        f"max abs err {jnp.max(jnp.abs(out - ref))}")

    print("KERNEL_OK")
</pallas_src>

<mosaic_0001>
module attributes {stable_mosaic.version = 11 : i64} {
  func.func @discriminator_kernel(%arg0: i32, %arg1: memref<16x64xf32, #tpu.memory_space<vmem>>, %arg2: memref<64x128xbf16, #tpu.memory_space<vmem>>, %arg3: memref<1x128xf32, #tpu.memory_space<vmem>>, %arg4: memref<128x512xbf16, #tpu.memory_space<vmem>>, %arg5: memref<1x512xf32, #tpu.memory_space<vmem>>, %arg6: memref<512x256xbf16, #tpu.memory_space<vmem>>, %arg7: memref<1x256xf32, #tpu.memory_space<vmem>>, %arg8: memref<256x128xbf16, #tpu.memory_space<vmem>>, %arg9: memref<1x128xf32, #tpu.memory_space<vmem>>, %arg10: memref<16x128xbf16, #tpu.memory_space<vmem>>) attributes {dimension_semantics = [#tpu.dimension_semantics<parallel>], iteration_bounds = array<i64: 2>, scalar_prefetch = 0 : i64, scratch_operands = 0 : i64, tpu.core_type = #tpu.core_type<tc>, window_params = [{transform_indices = @transform_0, window_bounds = array<i64: 16, 64>}, {pipeline_mode = #tpu.pipeline_mode<synchronous>, transform_indices = @transform_1, window_bounds = array<i64: 64, 128>}, {pipeline_mode = #tpu.pipeline_mode<synchronous>, transform_indices = @transform_2, window_bounds = array<i64: 1, 128>}, {pipeline_mode = #tpu.pipeline_mode<synchronous>, transform_indices = @transform_3, window_bounds = array<i64: 128, 512>}, {pipeline_mode = #tpu.pipeline_mode<synchronous>, transform_indices = @transform_4, window_bounds = array<i64: 1, 512>}, {pipeline_mode = #tpu.pipeline_mode<synchronous>, transform_indices = @transform_5, window_bounds = array<i64: 512, 256>}, {pipeline_mode = #tpu.pipeline_mode<synchronous>, transform_indices = @transform_6, window_bounds = array<i64: 1, 256>}, {pipeline_mode = #tpu.pipeline_mode<synchronous>, transform_indices = @transform_7, window_bounds = array<i64: 256, 128>}, {pipeline_mode = #tpu.pipeline_mode<synchronous>, transform_indices = @transform_8, window_bounds = array<i64: 1, 128>}, {transform_indices = @transform_9, window_bounds = array<i64: 16, 128>}]} {
    %c0 = arith.constant 0 : index
    %c0_0 = arith.constant 0 : index
    %0 = vector.load %arg1[%c0, %c0_0] : memref<16x64xf32, #tpu.memory_space<vmem>>, vector<16x64xf32>
    %1 = arith.truncf %0 : vector<16x64xf32> to vector<16x64xbf16>
    %c0_1 = arith.constant 0 : index
    %c0_2 = arith.constant 0 : index
    %2 = vector.load %arg2[%c0_1, %c0_2] : memref<64x128xbf16, #tpu.memory_space<vmem>>, vector<64x128xbf16>
    %cst = arith.constant dense<0.000000e+00> : vector<16x128xf32>
    %3 = tpu.matmul %1, %2, %cst {dimension_numbers = #tpu.dot_dimension_numbers<[1], [0], [0], [1], [0, 0, 1, 1], [], []>} : vector<16x64xbf16>, vector<64x128xbf16>, vector<16x128xf32> -> vector<16x128xf32>
    %c0_3 = arith.constant 0 : index
    %c0_4 = arith.constant 0 : index
    %4 = vector.load %arg3[%c0_3, %c0_4] : memref<1x128xf32, #tpu.memory_space<vmem>>, vector<1x128xf32>
    %5 = vector.broadcast %4 : vector<1x128xf32> to vector<16x128xf32>
    %6 = arith.addf %3, %5 : vector<16x128xf32>
    %cst_5 = arith.constant 0.000000e+00 : f32
    %7 = vector.broadcast %cst_5 : f32 to vector<16x128xf32>
    %8 = arith.maximumf %6, %7 : vector<16x128xf32>
    %9 = arith.truncf %8 : vector<16x128xf32> to vector<16x128xbf16>
    %c0_6 = arith.constant 0 : index
    %c0_7 = arith.constant 0 : index
    %10 = vector.load %arg4[%c0_6, %c0_7] : memref<128x512xbf16, #tpu.memory_space<vmem>>, vector<128x512xbf16>
    %cst_8 = arith.constant dense<0.000000e+00> : vector<16x512xf32>
    %11 = tpu.matmul %9, %10, %cst_8 {dimension_numbers = #tpu.dot_dimension_numbers<[1], [0], [0], [1], [0, 0, 1, 1], [], []>} : vector<16x128xbf16>, vector<128x512xbf16>, vector<16x512xf32> -> vector<16x512xf32>
    %c0_9 = arith.constant 0 : index
    %c0_10 = arith.constant 0 : index
    %12 = vector.load %arg5[%c0_9, %c0_10] : memref<1x512xf32, #tpu.memory_space<vmem>>, vector<1x512xf32>
    %13 = vector.broadcast %12 : vector<1x512xf32> to vector<16x512xf32>
    %14 = arith.addf %11, %13 : vector<16x512xf32>
    %cst_11 = arith.constant 0.000000e+00 : f32
    %15 = vector.broadcast %cst_11 : f32 to vector<16x512xf32>
    %16 = arith.maximumf %14, %15 : vector<16x512xf32>
    %17 = arith.truncf %16 : vector<16x512xf32> to vector<16x512xbf16>
    %c0_12 = arith.constant 0 : index
    %c0_13 = arith.constant 0 : index
    %18 = vector.load %arg6[%c0_12, %c0_13] : memref<512x256xbf16, #tpu.memory_space<vmem>>, vector<512x256xbf16>
    %cst_14 = arith.constant dense<0.000000e+00> : vector<16x256xf32>
    %19 = tpu.matmul %17, %18, %cst_14 {dimension_numbers = #tpu.dot_dimension_numbers<[1], [0], [0], [1], [0, 0, 1, 1], [], []>} : vector<16x512xbf16>, vector<512x256xbf16>, vector<16x256xf32> -> vector<16x256xf32>
    %c0_15 = arith.constant 0 : index
    %c0_16 = arith.constant 0 : index
    %20 = vector.load %arg7[%c0_15, %c0_16] : memref<1x256xf32, #tpu.memory_space<vmem>>, vector<1x256xf32>
    %21 = vector.broadcast %20 : vector<1x256xf32> to vector<16x256xf32>
    %22 = arith.addf %19, %21 : vector<16x256xf32>
    %cst_17 = arith.constant 0.000000e+00 : f32
    %23 = vector.broadcast %cst_17 : f32 to vector<16x256xf32>
    %24 = arith.maximumf %22, %23 : vector<16x256xf32>
    %25 = arith.truncf %24 : vector<16x256xf32> to vector<16x256xbf16>
    %c0_18 = arith.constant 0 : index
    %c0_19 = arith.constant 0 : index
    %26 = vector.load %arg8[%c0_18, %c0_19] : memref<256x128xbf16, #tpu.memory_space<vmem>>, vector<256x128xbf16>
    %cst_20 = arith.constant dense<0.000000e+00> : vector<16x128xf32>
    %27 = tpu.matmul %25, %26, %cst_20 {dimension_numbers = #tpu.dot_dimension_numbers<[1], [0], [0], [1], [0, 0, 1, 1], [], []>} : vector<16x256xbf16>, vector<256x128xbf16>, vector<16x128xf32> -> vector<16x128xf32>
    %c0_21 = arith.constant 0 : index
    %c0_22 = arith.constant 0 : index
    %28 = vector.load %arg9[%c0_21, %c0_22] : memref<1x128xf32, #tpu.memory_space<vmem>>, vector<1x128xf32>
    %29 = vector.broadcast %28 : vector<1x128xf32> to vector<16x128xf32>
    %30 = arith.addf %27, %29 : vector<16x128xf32>
    %cst_23 = arith.constant 0.000000e+00 : f32
    %31 = vector.broadcast %cst_23 : f32 to vector<16x128xf32>
    %32 = arith.subf %31, %30 : vector<16x128xf32>
    %33 = math.exp %32 : vector<16x128xf32>
    %cst_24 = arith.constant 1.000000e+00 : f32
    %34 = vector.broadcast %cst_24 : f32 to vector<16x128xf32>
    %35 = arith.addf %34, %33 : vector<16x128xf32>
    %cst_25 = arith.constant 1.000000e+00 : f32
    %36 = vector.broadcast %cst_25 : f32 to vector<16x128xf32>
    %37 = arith.divf %36, %35 : vector<16x128xf32>
    %38 = arith.truncf %37 : vector<16x128xf32> to vector<16x128xbf16>
    %c0_26 = arith.constant 0 : index
    %c0_27 = arith.constant 0 : index
    %39 = vector.load %arg10[%c0_26, %c0_27] : memref<16x128xbf16, #tpu.memory_space<vmem>>, vector<16x128xbf16>
    tpu.vector_store %arg10[%c0_26, %c0_27], %38 {strides = array<i32>} : memref<16x128xbf16, #tpu.memory_space<vmem>>, vector<16x128xbf16>,
    return
  }
  func.func @transform_0(%arg0: i32) -> (i32, i32) {
    %c0_i32 = arith.constant 0 : i32
    %c0_i32_0 = arith.constant 0 : i32
    return %arg0, %c0_i32 : i32, i32
  }
  func.func @transform_1(%arg0: i32) -> (i32, i32) {
    %c0_i32 = arith.constant 0 : i32
    %c0_i32_0 = arith.constant 0 : i32
    %c0_i32_1 = arith.constant 0 : i32
    return %c0_i32, %c0_i32_0 : i32, i32
  }
  func.func @transform_2(%arg0: i32) -> (i32, i32) {
    %c0_i32 = arith.constant 0 : i32
    %c0_i32_0 = arith.constant 0 : i32
    %c0_i32_1 = arith.constant 0 : i32
    return %c0_i32, %c0_i32_0 : i32, i32
  }
  func.func @transform_3(%arg0: i32) -> (i32, i32) {
    %c0_i32 = arith.constant 0 : i32
    %c0_i32_0 = arith.constant 0 : i32
    %c0_i32_1 = arith.constant 0 : i32
    return %c0_i32, %c0_i32_0 : i32, i32
  }
  func.func @transform_4(%arg0: i32) -> (i32, i32) {
    %c0_i32 = arith.constant 0 : i32
    %c0_i32_0 = arith.constant 0 : i32
    %c0_i32_1 = arith.constant 0 : i32
    return %c0_i32, %c0_i32_0 : i32, i32
  }
  func.func @transform_5(%arg0: i32) -> (i32, i32) {
    %c0_i32 = arith.constant 0 : i32
    %c0_i32_0 = arith.constant 0 : i32
    %c0_i32_1 = arith.constant 0 : i32
    return %c0_i32, %c0_i32_0 : i32, i32
  }
  func.func @transform_6(%arg0: i32) -> (i32, i32) {
    %c0_i32 = arith.constant 0 : i32
    %c0_i32_0 = arith.constant 0 : i32
    %c0_i32_1 = arith.constant 0 : i32
    return %c0_i32, %c0_i32_0 : i32, i32
  }
  func.func @transform_7(%arg0: i32) -> (i32, i32) {
    %c0_i32 = arith.constant 0 : i32
    %c0_i32_0 = arith.constant 0 : i32
    %c0_i32_1 = arith.constant 0 : i32
    return %c0_i32, %c0_i32_0 : i32, i32
  }
  func.func @transform_8(%arg0: i32) -> (i32, i32) {
    %c0_i32 = arith.constant 0 : i32
    %c0_i32_0 = arith.constant 0 : i32
    %c0_i32_1 = arith.constant 0 : i32
    return %c0_i32, %c0_i32_0 : i32, i32
  }
  func.func @transform_9(%arg0: i32) -> (i32, i32) {
    %c0_i32 = arith.constant 0 : i32
    %c0_i32_0 = arith.constant 0 : i32
    return %arg0, %c0_i32 : i32, i32
  }
}

</mosaic_0001>

<bundles_post_ra>
// kernel: tpu_custom_call.1
= control target key start
LH: loop header
LB: loop body
LE: loop exit
PB: predicated region body
PF: predicated region fallthrough
CT: control target
= control target key end

     0   :  { %s2854_s0 = inlined_call_operand.hbm [shape: f32[32,64], index: 0, kind: input, shape index: {}]   ;;  %s2855_s1 = inlined_call_operand.hbm [shape: bf16[64,128], index: 1, kind: input, shape index: {}]   ;;  %s2856_s2 = inlined_call_operand.vmem [shape: f32[1,128], index: 2, kind: input, shape index: {}]   ;;  %s2857_s3 = inlined_call_operand.hbm [shape: bf16[128,512], index: 3, kind: input, shape index: {}]   ;;  %s2858_s4 = inlined_call_operand.hbm [shape: f32[1,512], index: 4, kind: input, shape index: {}]   ;;  %s2859_s5 = inlined_call_operand.hbm [shape: bf16[512,256], index: 5, kind: input, shape index: {}]   ;;  %s2860_s6 = inlined_call_operand.vmem [shape: f32[1,256], index: 6, kind: input, shape index: {}]   ;;  %s2861_s7 = inlined_call_operand.hbm [shape: bf16[256,128], index: 7, kind: input, shape index: {}]   ;;  %s2862_s8 = inlined_call_operand.vmem [shape: f32[1,128], index: 8, kind: input, shape index: {}]   ;;  %s2863_s9 = inlined_call_operand.hbm [shape: bf16[32,128], index: 9, kind: output, shape index: {}]  }
   0x1   :  { %2866 = sst [smem:[#allocation19_spill]] %s2855_s1 }
   0x2   :  { %2867 = sst [smem:[#allocation20_spill]] %s2857_s3 }
   0x3   :  { %2868 = sst [smem:[#allocation21_spill]] %s2858_s4 }
   0x4   :  { %14 = vsyncpa [#allocation3], 0 }
   0x5   :  { %16 = vsyncpa [#allocation3 + $0x1], 0 }
   0x6   :  { %17 = vsyncpa [#allocation6], 0 }
   0x7   :  { %18 = vsyncpa [#allocation9], 0 }
   0x8   :  { %19 = vsyncpa [#allocation12], 0 }
   0x9   :  { %20 = vsyncpa [#allocation4], 0 }
   0xa   :  { %22 = vsyncpa [#allocation4 + $0x1], 0  ;;  %s2664_s30 = smov 0   ;;  %s2666_s10 = smov 0  }
   0xb   :  { %s2668_s11 = smov 0   ;;  %s2670_s12 = smov 0  }
   0xc LB: > { %s2869_s1 = sld [smem:[#allocation19_spill]]  ;;  %s2688_s16 = sadd.s32 4294967295, %s2599_s12   ;;  %s2599_s12 = sphi %s2670_s12, %s2884_s12   ;;  %s2595_s11 = sphi %s2668_s11, %s2883_s11   ;;  %s2591_s10 = sphi %s2666_s10, %s2882_s10   ;;  %s2587_s30 = sphi %s2664_s30, %s2881_s30  }
   0xd   : > { %p1615_p0 = scmp.ge.s32.totalorder %s2599_s12, 1  ;;  %p49_p1 = scmp.eq.s32.totalorder %s2688_s16, 0 }
   0xe   : > { %p253_p2 = scmp.lt.s32.totalorder %s2599_s12, 3  ;;  %s2601_s18 = smov [#allocation5]  }
   0xf   : > { %s266_s19 = sshll.u32 %s2601_s18, 4  ;;  %s2871_s4 = sld [smem:[#allocation21_spill]]  ;;  %s267_s19 = int_to_ptr.vmem [resolvable:$true] %s266_s19 }
  0x10   : > { %p2693_p3 = pnand %p1615_p0, %p253_p2  ;;  %s2873_s3 = sld [smem:[#allocation20_spill]] }
  0x11   : > { %s2602_s27 = smov [#allocation8]   ;;  %s2603_s29 = smov 64  }
  0x12   : > { %s264_s15 = sshll.u32 %s2869_s1, 4  ;;  %p2250_p4 = pneg %p2693_p3  ;;  %s265_s15 = int_to_ptr.hbm [resolvable:$true] %s264_s15 }
  0x13   : > { %s298_s28 = sshll.u32 %s2602_s27, 4  ;;  %s2604_s13 = smov 4   ;;  %s299_s28 = int_to_ptr.vmem [resolvable:$true] %s298_s28 }
  0x14   : > { %p2705_p6 = pnand %p2250_p4, %p49_p1  ;;  %s2605_s14 = smov [#allocation7]  }
  0x15   : > { %s296_s22 = sshll.u32 %s2871_s4, 4  ;;  %s283_s18 = sshll.u32 %s2605_s14, 4  ;;  %s297_s22 = int_to_ptr.hbm [resolvable:$true] %s296_s22  ;;  %s284_s18 = int_to_ptr.vmem [resolvable:$true] %s283_s18 }
  0x16   : > { %s281_s26 = sshll.u32 %s2873_s3, 4  ;;  %s307_s24 = sshll.u32 %s2859_s5, 4  ;;  %s282_s26 = int_to_ptr.hbm [resolvable:$true] %s281_s26  ;;  %s308_s24 = int_to_ptr.hbm [resolvable:$true] %s307_s24 }
  0x17   : > { %2253 = dma.hbm_to_vmem [thread:$0]  (!%p2705_p6), %s265_s15, 512, %s267_s19, [#allocation6], %s2603_s29, %s2603_s29, %s2604_s13  }
  0x18   : > { %2259 = dma.hbm_to_vmem [thread:$0]  (!%p2705_p6), %s297_s22, 64, %s299_s28, [#allocation9]  }
  0x19   : > { %s2606_s25 = smov 256   ;;  %s2607_s27 = smov 16  }
  0x1a   : > { %2256 = dma.hbm_to_vmem [thread:$0]  (!%p2705_p6), %s282_s26, 4096, %s284_s18, [#allocation6], %s2606_s25, %s2606_s25, %s2607_s27  }
  0x1b   : > { %s2608_s15 = smov [#allocation10]   ;;  %s2864_s22 = smov 128  }
  0x1c   : > { %s309_s19 = sshll.u32 %s2608_s15, 4  ;;  %s2865_s28 = smov 8   ;;  %s310_s19 = int_to_ptr.vmem [resolvable:$true] %s309_s19 }
  0x1d   : > { %2262 = dma.hbm_to_vmem [thread:$0]  (!%p2705_p6), %s308_s24, 8192, %s310_s19, [#allocation9], %s2864_s22, %s2864_s22, %s2865_s28  }
  0x1e   : > { %s324_s18 = sshll.u32 %s2861_s7, 4  ;;  %s2611_s20 = smov [#allocation11]   ;;  %s325_s18 = int_to_ptr.hbm [resolvable:$true] %s324_s18 }
  0x1f   : > { %s326_s21 = sshll.u32 %s2611_s20, 4  ;;  %s1614_s25 = sadd.s32 4294967294, %s2599_s12   ;;  %s327_s21 = int_to_ptr.vmem [resolvable:$true] %s326_s21 }
  0x20   : > { %2265 = dma.hbm_to_vmem [thread:$0]  (!%p2705_p6), %s325_s18, 2048, %s327_s21, [#allocation12], %s2603_s29, %s2603_s29, %s2604_s13  }
  0x21   : > { %s2733_s27 = sadd.s32 1, %s2599_s12   ;;  %s35_s15 = sadd.s32 1, %s2595_s11 }
  0x22   : > { %s32_s24 = ssub.s32 %s2599_s12, %s2733_s27  ;;  %p42_p7 = scmp.ne.s32.totalorder %s2595_s11, %s2591_s10 }
  0x23   : > { %p33_p8 = scmp.eq.s32.totalorder %s32_s24, 0  ;;  %p43_p9 = scmp.eq.s32.totalorder %s2599_s12, 0 }
  0x24   : > { %p48_p10 = scmp.ne.s32.totalorder %s2591_s10, %s2587_s30  ;;  %p240_p11 = scmp.eq.s32.totalorder %s2688_s16, 1 }
  0x25   : > { %s2745_s19 = scalar_select %p33_p8, %s2595_s11, %s35_s15  }
  0x26   : > { %p2749_p12 = por %p49_p1, %p48_p10  ;;  %p2753_p13 = por %p240_p11, %p42_p7 }
  0x27   : > { %p246_p0 = scmp.eq.s32.totalorder %s1614_s25, 1  ;;  %p44_p2 = por %p43_p9, %p42_p7 }
  0x28   : > { %s343_s13 = sand.u32 1, %s2595_s11   ;;  %p2279_p6 = scmp.lt.s32.totalorder %s2599_s12, 2 }
  0x29   : > { %p2758_p4 = por %p246_p0, %p48_p10  ;;  %s1622_s14 = sshll.u32 %s343_s13, 4 }
  0x2a   : > { %s2103_s18 = sshll.u32 %s2599_s12, 4  ;;  %s347_s22 = scalar_lea.vmem [#allocation2], %s1622_s14 }
  0x2b   : > { %s352_s15 = scalar_lea.hbm %s2854_s0, %s2103_s18  ;;  %s355_s28 = sshll.u32 %s347_s22, 4  ;;  %s356_s28 = int_to_ptr.vmem [resolvable:$true] %s355_s28 }
  0x2c   : > { %s353_s24 = sshll.u32 %s352_s15, 4  ;;  %p2767_p8 = pnand %p2279_p6, %p44_p2  ;;  %s354_s24 = int_to_ptr.hbm [resolvable:$true] %s353_s24 }
  0x2d   : > { %s344_s1 = scalar_lea.sflag [#allocation3], %s343_s13  ;;  %s2491_s3 = sshra.s32 %s354_s24, 4  ;;  %s2492_s3 = int_to_ptr.hbm [resolvable:$true] %s2491_s3 }
  0x2e   : > { %s2493_s4 = scalar_lea.hbm %s2492_s3, 16  ;;  %p2495_p9 = pneg %p2767_p8 }
  0x2f   : > { %p2494_p7 = scmp.ne.s32.totalorder %s2492_s3, %s2493_s4  ;;  %s2498_s22 = scalar_lea.hbm %s2854_s0, 32 }
  0x30   : > { %p2499_p0 = scmp.lt.s32.totalorder %s2492_s3, %s2854_s0  ;;  %p2500_p2 = scmp.lt.s32.totalorder %s2498_s22, %s2493_s4 }
  0x31   : > { %p2496_p10 = pnand %p2495_p9, %p2494_p7 }
  0x32   : > { %p2501_p6 = por %p2500_p2, %p2499_p0 }
  0x33   : > { %p2497_p11 = pneg %p2496_p10 }
  0x35   : > { %p2502_p5 = pnand %p2501_p6, %p2497_p11 }
  0x37   : > { %2505 = shalt.err (!%p2502_p5)
}
  0x38   : > { %s2878_s13 = smov 8   ;;  %s2879_s15 = smov 128  }
  0x39   : > { %2269 = dma.hbm_to_vmem [thread:$0]  (!%p2767_p8), %s354_s24, 256, %s356_s28, %s344_s1, %s2879_s15, %s2879_s15, %s2878_s13  }
  0x3a   : > { %367 = sbr.rel (%p2693_p3) target bundleno = 716 (0x2cc), region = 56  ;;  %s2787_s18 = sand.u32 (!%p2693_p3), 1, %s2591_s10  }
  0x3b   : > { %s1626_s3 = sshll.u32 (!%p2693_p3), %s2787_s18, 4  ;;  %s370_s4 = scalar_lea.sflag (!%p2693_p3), [#allocation3], %s2787_s18 }
  0x3c   : > { %s2791_s20 = scalar_lea.vmem (!%p2693_p3), [#allocation2], %s1626_s3 }
  0x3f   : > { %2566 = dma.done.wait (%p2749_p12), %s370_s4, 256  }
  0x40   : > { %2568 = vsyncadd (%p2749_p12), %s370_s4, 4294967040 }
  0x41   : > { %2570 = dma.done.wait (%p49_p1), [#allocation6], 4608  }
  0x42   : > { %2572 = vsyncadd (%p49_p1), [#allocation6], 4294962688 }
  0x43   : > { %2574 = dma.done.wait (%p49_p1), [#allocation9], 8256  }
  0x44   : > { %2576 = vsyncadd (%p49_p1), [#allocation9], 4294959040 }
  0x45   : > { %2578 = dma.done.wait (%p49_p1), [#allocation12], 2048  }
  0x46   : > { %2580 = vsyncadd (%p49_p1), [#allocation12], 4294965248  ;;  %v2107_v0 = vld [vmem:[#allocation5 + $0x18] sm:$0xff]  ;;  %v2106_v1 = vld [vmem:[#allocation5 + $0x10] sm:$0xff]  ;;  %vm476_vm0 = vcmask 523264   ;;  %s1632_s22 = sshll.u32 %s2787_s18, 3 }
  0x47   : > { %484 = vmatpush.bf16.msra.mxu0 %v2107_v0  ;;  %v1764_v2 = vld [vmem:[#allocation7 + $0xe0] sm:$0xf]  ;;  %v2138_v3 = vld [vmem:[#allocation7 + $0xec] sm:$0xf0]  ;;  %v2136_v4 = vld [vmem:[#allocation7 + $0xe4] sm:$0xf] }
  0x48   : > { %v1765_v5 = vor.u32 %v2138_v3, %v1764_v2  ;;  %v1766_v6 = vld [vmem:[#allocation7 + $0xf0] sm:$0xf0]  ;;  %v1772_v7 = vld [vmem:[#allocation7 + $0xe8] sm:$0xf]  ;;  %v2139_v8 = vld [vmem:[#allocation7 + $0xf4] sm:$0xf0] }
  0x49   : > { %v2105_v9 = vld [vmem:[#allocation5 + $0x8] sm:$0xff]  ;;  %v1769_v10 = vor.u32 %v2136_v4, %v1766_v6  ;;  %v1773_v11 = vor.u32 %v2139_v8, %v1772_v7  ;;  %v1748_v12 = vld [vmem:[#allocation7 + $0xc0] sm:$0xf]  ;;  %v2134_v13 = vld [vmem:[#allocation7 + $0xcc] sm:$0xf0]  ;;  %s2220_s14 = sshll.u32 %s2688_s16, 3 }
  0x4a   : > { %699 = vmatpush.bf16.msra.mxu1 %v1765_v5  ;;  %v2132_v14 = vld [vmem:[#allocation7 + $0xc4] sm:$0xf]  ;;  %v1750_v15 = vld [vmem:[#allocation7 + $0xd0] sm:$0xf0]  ;;  %v2137_v16 = vld [vmem:[#allocation7 + $0xec] sm:$0xf]  ;;  %v1749_v17 = vor.u32 %v2134_v13, %v1748_v12  ;;  %s1489_s15 = scalar_lea.hbm %s2863_s9, %s2220_s14 }
  0x4b   : > { %485 = vmatpush.bf16.msra.mxu0 %v2106_v1  ;;  %713 = vmatpush.bf16.msra.mxu2 %v1769_v10  ;;  %v1753_v18 = vor.u32 %v2132_v14, %v1750_v15  ;;  %v1756_v19 = vld [vmem:[#allocation7 + $0xc8] sm:$0xf]  ;;  %v2135_v20 = vld [vmem:[#allocation7 + $0xd4] sm:$0xf0]  ;;  %v1774_v21 = vld [vmem:[#allocation7 + $0xf8] sm:$0xf0] }
  0x4c   : > { %727 = vmatpush.bf16.msra.mxu3 %v1773_v11  ;;  %v1757_v22 = vor.u32 %v2135_v20, %v1756_v19  ;;  %v1732_v23 = vld [vmem:[#allocation7 + $0xa0] sm:$0xf]  ;;  %v2130_v24 = vld [vmem:[#allocation7 + $0xac] sm:$0xf0]  ;;  %v2128_v26 = vld [vmem:[#allocation7 + $0xa4] sm:$0xf]  ;;  %v1777_v37 = vor.u32 %v2137_v16, %v1774_v21 }
  0x4d   : > { %v2104_v25 = vld [vmem:[#allocation5] sm:$0xff]  ;;  %v1734_v27 = vld [vmem:[#allocation7 + $0xb0] sm:$0xf0]  ;;  %v1740_v28 = vld [vmem:[#allocation7 + $0xa8] sm:$0xf]  ;;  %v1733_v31 = vor.u32 %v2130_v24, %v1732_v23  ;;  %s433_s16 = scalar_lea.vmem [#allocation13], %s1632_s22 }
  0x4e   : > { %v437_v29 = vld [vmem:[%s2791_s20] sm:$0xff]  ;;  %v438_v30 = vld [vmem:[%s2791_s20 + $0x8] sm:$0xff]  ;;  %700 = vmatpush.bf16.msra.mxu1 %v1749_v17  ;;  %v1737_v34 = vor.u32 %v2128_v26, %v1734_v27  ;;  %s1490_s3 = sshll.u32 %s433_s16, 4  ;;  %s1492_s4 = sshll.u32 %s1489_s15, 4  ;;  %s1491_s3 = int_to_ptr.vmem [resolvable:$true] %s1490_s3  ;;  %s1493_s4 = int_to_ptr.hbm [resolvable:$true] %s1492_s4 }
  0x4f   : > { %v2131_v32 = vld [vmem:[#allocation7 + $0xb4] sm:$0xf0]  ;;  %486 = vmatpush.bf16.msra.mxu0 %v2105_v9  ;;  %714 = vmatpush.bf16.msra.mxu2 %v1753_v18  ;;  %v2133_v33 = vld [vmem:[#allocation7 + $0xcc] sm:$0xf]  ;;  %v1716_v35 = vld [vmem:[#allocation7 + $0x80] sm:$0xf]  ;;  %v439_v44 = vpack.c.bf16 %v438_v30, %v437_v29 }
  0x50   : > { %v2126_v36 = vld [vmem:[#allocation7 + $0x8c] sm:$0xf0]  ;;  %728 = vmatpush.bf16.msra.mxu3 %v1757_v22  ;;  %v1758_v38 = vld [vmem:[#allocation7 + $0xd8] sm:$0xf0]  ;;  %v1741_v39 = vor.u32 %v2131_v32, %v1740_v28  ;;  %v2124_v40 = vld [vmem:[#allocation7 + $0x84] sm:$0xf] }
  0x51   : > { %v1718_v41 = vld [vmem:[#allocation7 + $0x90] sm:$0xf0]  ;;  %v1724_v42 = vld [vmem:[#allocation7 + $0x88] sm:$0xf]  ;;  %v2127_v43 = vld [vmem:[#allocation7 + $0x94] sm:$0xf0]  ;;  %v1717_v45 = vor.u32 %v2126_v36, %v1716_v35  ;;  %v1761_v47 = vor.u32 %v2133_v33, %v1758_v38 }
  0x52   : > { %701 = vmatpush.bf16.msra.mxu1 %v1733_v31  ;;  %v1721_v46 = vor.u32 %v2124_v40, %v1718_v41  ;;  %v1725_v48 = vor.u32 %v2127_v43, %v1724_v42  ;;  %v2129_v49 = vld [vmem:[#allocation7 + $0xac] sm:$0xf]  ;;  %v1742_v50 = vld [vmem:[#allocation7 + $0xb8] sm:$0xf0]  ;;  %v1700_v55 = vld [vmem:[#allocation7 + $0x60] sm:$0xf] }
  0x53   : > { %487 = vmatpush.bf16.msra.mxu0 %v2104_v25  ;;  %715 = vmatpush.bf16.msra.mxu2 %v1737_v34  ;;  %v1745_v51 = vor.u32 %v2129_v49, %v1742_v50  ;;  %v2125_v52 = vld [vmem:[#allocation7 + $0x8c] sm:$0xf]  ;;  %v1726_v53 = vld [vmem:[#allocation7 + $0x98] sm:$0xf0]  ;;  %v2122_v56 = vld [vmem:[#allocation7 + $0x6c] sm:$0xf0] }
  0x54   : > { %729 = vmatpush.bf16.msra.mxu3 %v1741_v39  ;;  %v1729_v54 = vor.u32 %v2125_v52, %v1726_v53  ;;  %v2120_v57 = vld [vmem:[#allocation7 + $0x64] sm:$0xf]  ;;  %v1701_v58 = vor.u32 %v2122_v56, %v1700_v55  ;;  %v1702_v59 = vld [vmem:[#allocation7 + $0x70] sm:$0xf0]  ;;  %v1708_v60 = vld [vmem:[#allocation7 + $0x68] sm:$0xf] }
  0x55   : > { %v2123_v61 = vld [vmem:[#allocation7 + $0x74] sm:$0xf0]  ;;  %v1705_v62 = vor.u32 %v2120_v57, %v1702_v59  ;;  %v2121_v0 = vld [vmem:[#allocation7 + $0x6c] sm:$0xf]  ;;  %v1710_v1 = vld [vmem:[#allocation7 + $0x78] sm:$0xf0] }
  0x56   : > { %1649 = vmatmul.msk.bf16.vlgmr.msra.gmra.mxu0 %vm476_vm0, %v439_v44  ;;  %702 = vmatpush.bf16.msra.mxu1 %v1717_v45  ;;  %v1709_v63 = vor.u32 %v2123_v61, %v1708_v60  ;;  %v1713_v2 = vor.u32 %v2121_v0, %v1710_v1  ;;  %v1684_v3 = vld [vmem:[#allocation7 + $0x40] sm:$0xf]  ;;  %v2118_v4 = vld [vmem:[#allocation7 + $0x4c] sm:$0xf0]  ;;  %v2116_v5 = vld [vmem:[#allocation7 + $0x44] sm:$0xf] }
  0x57   : > { %741 = vmatpush.bf16.msrb.mxu0 %v1777_v37  ;;  %716 = vmatpush.bf16.msra.mxu2 %v1721_v46  ;;  %v1685_v6 = vor.u32 %v2118_v4, %v1684_v3  ;;  %v1686_v7 = vld [vmem:[#allocation7 + $0x50] sm:$0xf0]  ;;  %v1692_v8 = vld [vmem:[#allocation7 + $0x48] sm:$0xf]  ;;  %v2119_v9 = vld [vmem:[#allocation7 + $0x54] sm:$0xf0] }
  0x58   : > { %730 = vmatpush.bf16.msra.mxu3 %v1725_v48  ;;  %v1689_v10 = vor.u32 %v2116_v5, %v1686_v7  ;;  %v1693_v11 = vor.u32 %v2119_v9, %v1692_v8  ;;  %v2117_v12 = vld [vmem:[#allocation7 + $0x4c] sm:$0xf]  ;;  %v1694_v13 = vld [vmem:[#allocation7 + $0x58] sm:$0xf0]  ;;  %v1668_v15 = vld [vmem:[#allocation7 + $0x20] sm:$0xf] }
  0x59   : > { %v1697_v14 = vor.u32 %v2117_v12, %v1694_v13  ;;  %v2114_v16 = vld [vmem:[#allocation7 + $0x2c] sm:$0xf0]  ;;  %v2112_v17 = vld [vmem:[#allocation7 + $0x24] sm:$0xf]  ;;  %v1670_v19 = vld [vmem:[#allocation7 + $0x30] sm:$0xf0] }
  0x5a   : > { %703 = vmatpush.bf16.msra.mxu1 %v1701_v58  ;;  %v1669_v18 = vor.u32 %v2114_v16, %v1668_v15  ;;  %v1676_v20 = vld [vmem:[#allocation7 + $0x28] sm:$0xf]  ;;  %v2115_v21 = vld [vmem:[#allocation7 + $0x34] sm:$0xf0]  ;;  %v1673_v22 = vor.u32 %v2112_v17, %v1670_v19  ;;  %v2113_v24 = vld [vmem:[#allocation7 + $0x2c] sm:$0xf] }
  0x5b   : > { %742 = vmatpush.bf16.msrb.mxu0 %v1761_v47  ;;  %717 = vmatpush.bf16.msra.mxu2 %v1705_v62  ;;  %v1677_v23 = vor.u32 %v2115_v21, %v1676_v20  ;;  %v1678_v25 = vld [vmem:[#allocation7 + $0x38] sm:$0xf0]  ;;  %v1652_v27 = vld [vmem:[#allocation7] sm:$0xf]  ;;  %v2110_v28 = vld [vmem:[#allocation7 + $0xc] sm:$0xf0] }
  0x5c   : > { %731 = vmatpush.bf16.msra.mxu3 %v1709_v63  ;;  %v1681_v26 = vor.u32 %v2113_v24, %v1678_v25  ;;  %v2108_v29 = vld [vmem:[#allocation7 + $0x4] sm:$0xf]  ;;  %v1653_v30 = vor.u32 %v2110_v28, %v1652_v27  ;;  %v1654_v31 = vld [vmem:[#allocation7 + $0x10] sm:$0xf0]  ;;  %v1660_v32 = vld [vmem:[#allocation7 + $0x8] sm:$0xf] }
  0x5d   : > { %v2111_v33 = vld [vmem:[#allocation7 + $0x14] sm:$0xf0]  ;;  %v1657_v34 = vor.u32 %v2108_v29, %v1654_v31  ;;  %v2109_v36 = vld [vmem:[#allocation7 + $0xc] sm:$0xf]  ;;  %v1662_v37 = vld [vmem:[#allocation7 + $0x18] sm:$0xf0] }
  0x5e   : > { %704 = vmatpush.bf16.msra.mxu1 %v1685_v6  ;;  %v1661_v35 = vor.u32 %v2111_v33, %v1660_v32  ;;  %v1665_v38 = vor.u32 %v2109_v36, %v1662_v37  ;;  %v1836_v39 = vld [vmem:[#allocation10 + $0x70] sm:$0xf]  ;;  %v2155_v40 = vld [vmem:[#allocation10 + $0x74] sm:$0xf0]  ;;  %v1828_v44 = vld [vmem:[#allocation10 + $0x60] sm:$0xf] }
  0x5f   : > { %743 = vmatpush.bf16.msrb.mxu0 %v1745_v51  ;;  %718 = vmatpush.bf16.msra.mxu2 %v1689_v10  ;;  %v2028_v41 = vld [vmem:[#allocation10 + $0x1f0] sm:$0xf]  ;;  %v1837_v42 = vor.u32 %v2155_v40, %v1836_v39  ;;  %v2203_v43 = vld [vmem:[#allocation10 + $0x1f4] sm:$0xf0]  ;;  %v2153_v45 = vld [vmem:[#allocation10 + $0x64] sm:$0xf0] }
  0x60   : > { %732 = vmatpush.bf16.msra.mxu3 %v1693_v11  ;;  %v2029_v46 = vor.u32 %v2203_v43, %v2028_v41  ;;  %v2020_v47 = vld [vmem:[#allocation10 + $0x1e0] sm:$0xf]  ;;  %v2201_v48 = vld [vmem:[#allocation10 + $0x1e4] sm:$0xf0]  ;;  %v1900_v49 = vld [vmem:[#allocation10 + $0xf0] sm:$0xf]  ;;  %v1829_v50 = vor.u32 %v2153_v45, %v1828_v44 }
  0x61   : > { %v2171_v51 = vld [vmem:[#allocation10 + $0xf4] sm:$0xf0]  ;;  %v1964_v52 = vld [vmem:[#allocation10 + $0x170] sm:$0xf]  ;;  %v1892_v61 = vld [vmem:[#allocation10 + $0xe0] sm:$0xf] }
  0x62   : > { %705 = vmatpush.bf16.msra.mxu1 %v1669_v18  ;;  %v2187_v53 = vld [vmem:[#allocation10 + $0x174] sm:$0xf0]  ;;  %v1901_v55 = vor.u32 %v2171_v51, %v1900_v49  ;;  %v1820_v57 = vld [vmem:[#allocation10 + $0x50] sm:$0xf]  ;;  %v2169_v62 = vld [vmem:[#allocation10 + $0xe4] sm:$0xf0] }
  0x63   : > { %744 = vmatpush.bf16.msrb.mxu0 %v1729_v54  ;;  %719 = vmatpush.bf16.msra.mxu2 %v1673_v22  ;;  %v2021_v54 = vor.u32 %v2201_v48, %v2020_v47  ;;  %v1965_v56 = vor.u32 %v2187_v53, %v1964_v52  ;;  %v2151_v58 = vld [vmem:[#allocation10 + $0x54] sm:$0xf0]  ;;  %v2012_v59 = vld [vmem:[#allocation10 + $0x1d0] sm:$0xf]  ;;  %v1893_v63 = vor.u32 %v2169_v62, %v1892_v61  ;;  %v1956_v0 = vld [vmem:[#allocation10 + $0x160] sm:$0xf] }
  0x64   : > { %733 = vmatpush.bf16.msra.mxu3 %v1677_v23  ;;  %v2199_v60 = vld [vmem:[#allocation10 + $0x1d4] sm:$0xf0]  ;;  %v2185_v1 = vld [vmem:[#allocation10 + $0x164] sm:$0xf0]  ;;  %v1812_v4 = vld [vmem:[#allocation10 + $0x40] sm:$0xf] }
  0x65   : > { %v1957_v3 = vor.u32 %v2185_v1, %v1956_v0  ;;  %v2149_v5 = vld [vmem:[#allocation10 + $0x44] sm:$0xf0]  ;;  %v2013_v6 = vor.u32 %v2199_v60, %v2012_v59  ;;  %v1884_v7 = vld [vmem:[#allocation10 + $0xd0] sm:$0xf]  ;;  %v2167_v8 = vld [vmem:[#allocation10 + $0xd4] sm:$0xf0] }
  0x66   : > { %706 = vmatpush.bf16.msra.mxu1 %v1653_v30  ;;  %v1948_v9 = vld [vmem:[#allocation10 + $0x150] sm:$0xf]  ;;  %v2004_v10 = vld [vmem:[#allocation10 + $0x1c0] sm:$0xf]  ;;  %v2197_v11 = vld [vmem:[#allocation10 + $0x1c4] sm:$0xf0]  ;;  %v1885_v13 = vor.u32 %v2167_v8, %v1884_v7  ;;  %v1813_v16 = vor.u32 %v2149_v5, %v1812_v4 }
  0x67   : > { %745 = vmatpush.bf16.msrb.mxu0 %v1713_v2  ;;  %720 = vmatpush.bf16.msra.mxu2 %v1657_v34  ;;  %v1821_v2 = vor.u32 %v2151_v58, %v1820_v57  ;;  %v2183_v12 = vld [vmem:[#allocation10 + $0x154] sm:$0xf0]  ;;  %v1876_v15 = vld [vmem:[#allocation10 + $0xc0] sm:$0xf]  ;;  %v2165_v17 = vld [vmem:[#allocation10 + $0xc4] sm:$0xf0]  ;;  %v2005_v20 = vor.u32 %v2197_v11, %v2004_v10 }
  0x68   : > { %734 = vmatpush.bf16.msra.mxu3 %v1661_v35  ;;  %v1940_v18 = vld [vmem:[#allocation10 + $0x140] sm:$0xf]  ;;  %v2181_v19 = vld [vmem:[#allocation10 + $0x144] sm:$0xf0]  ;;  %v1804_v21 = vld [vmem:[#allocation10 + $0x30] sm:$0xf]  ;;  %v1877_v25 = vor.u32 %v2165_v17, %v1876_v15 }
  0x69   : > { %v2147_v22 = vld [vmem:[#allocation10 + $0x34] sm:$0xf0]  ;;  %v1996_v23 = vld [vmem:[#allocation10 + $0x1b0] sm:$0xf]  ;;  %v1796_v34 = vld [vmem:[#allocation10 + $0x20] sm:$0xf] }
  0x6a   : > { %1157 = vmatpush.bf16.msrb.mxu1 %v1837_v42  ;;  %v2195_v24 = vld [vmem:[#allocation10 + $0x1b4] sm:$0xf0]  ;;  %v1868_v27 = vld [vmem:[#allocation10 + $0xb0] sm:$0xf]  ;;  %v1805_v28 = vor.u32 %v2147_v22, %v1804_v21  ;;  %v2145_v35 = vld [vmem:[#allocation10 + $0x24] sm:$0xf0] }
  0x6b   : > { %746 = vmatpush.bf16.msrb.mxu0 %v1697_v14  ;;  %1171 = vmatpush.bf16.msrb.mxu2 %v1901_v55  ;;  %v1949_v14 = vor.u32 %v2183_v12, %v1948_v9  ;;  %v2163_v29 = vld [vmem:[#allocation10 + $0xb4] sm:$0xf0]  ;;  %v1932_v30 = vld [vmem:[#allocation10 + $0x130] sm:$0xf]  ;;  %v1997_v33 = vor.u32 %v2195_v24, %v1996_v23  ;;  %v1988_v36 = vld [vmem:[#allocation10 + $0x1a0] sm:$0xf]  ;;  %v1797_v42 = vor.u32 %v2145_v35, %v1796_v34 }
  0x6c   : > { %1185 = vmatpush.bf16.msrb.mxu3 %v1965_v56  ;;  %v2179_v31 = vld [vmem:[#allocation10 + $0x134] sm:$0xf0]  ;;  %v2193_v37 = vld [vmem:[#allocation10 + $0x1a4] sm:$0xf0]  ;;  %v1869_v39 = vor.u32 %v2163_v29, %v1868_v27  ;;  %v1860_v41 = vld [vmem:[#allocation10 + $0xa0] sm:$0xf] }
  0x6d   : > { %v1933_v40 = vor.u32 %v2179_v31, %v1932_v30  ;;  %v2161_v43 = vld [vmem:[#allocation10 + $0xa4] sm:$0xf0]  ;;  %v1924_v44 = vld [vmem:[#allocation10 + $0x120] sm:$0xf]  ;;  %v1788_v47 = vld [vmem:[#allocation10 + $0x10] sm:$0xf] }
  0x6e   : > { %1158 = vmatpush.bf16.msrb.mxu1 %v1829_v50  ;;  %v2177_v45 = vld [vmem:[#allocation10 + $0x124] sm:$0xf0]  ;;  %v2143_v48 = vld [vmem:[#allocation10 + $0x14] sm:$0xf0]  ;;  %v1980_v49 = vld [vmem:[#allocation10 + $0x190] sm:$0xf]  ;;  %v1861_v51 = vor.u32 %v2161_v43, %v1860_v41 }
  0x6f   : > { %747 = vmatpush.bf16.msrb.mxu0 %v1681_v26  ;;  %1172 = vmatpush.bf16.msrb.mxu2 %v1893_v63  ;;  %v1941_v26 = vor.u32 %v2181_v19, %v1940_v18  ;;  %v2191_v50 = vld [vmem:[#allocation10 + $0x194] sm:$0xf0]  ;;  %v1925_v52 = vor.u32 %v2177_v45, %v1924_v44  ;;  %v1780_v58 = vld [vmem:[#allocation10] sm:$0xf]  ;;  %v2141_v59 = vld [vmem:[#allocation10 + $0x4] sm:$0xf0] }
  0x70   : > { %1186 = vmatpush.bf16.msrb.mxu3 %v1957_v3  ;;  %v1981_v56 = vor.u32 %v2191_v50, %v1980_v49  ;;  %v1972_v60 = vld [vmem:[#allocation10 + $0x180] sm:$0xf]  ;;  %v2189_v61 = vld [vmem:[#allocation10 + $0x184] sm:$0xf0]  ;;  %v1781_v1 = vor.u32 %v2141_v59, %v1780_v58  ;;  %v2154_v3 = vld [vmem:[#allocation10 + $0x74] sm:$0xf] }
  0x71   : > { %v1838_v4 = vld [vmem:[#allocation10 + $0x78] sm:$0xf0]  ;;  %v2202_v5 = vld [vmem:[#allocation10 + $0x1f4] sm:$0xf]  ;;  %v1852_v8 = vld [vmem:[#allocation10 + $0x90] sm:$0xf] }
  0x72   : > { %1159 = vmatpush.bf16.msrb.mxu1 %v1821_v2  ;;  %v1973_v2 = vor.u32 %v2189_v61, %v1972_v60  ;;  %v2030_v7 = vld [vmem:[#allocation10 + $0x1f8] sm:$0xf0]  ;;  %v2159_v9 = vld [vmem:[#allocation10 + $0x94] sm:$0xf0]  ;;  %v1916_v12 = vld [vmem:[#allocation10 + $0x110] sm:$0xf] }
  0x73   : > { %748 = vmatpush.bf16.msrb.mxu0 %v1665_v38  ;;  %1173 = vmatpush.bf16.msrb.mxu2 %v1885_v13  ;;  %v2331_v38 = vld [vmem:[%s2856_s2] ss:$0 sm:$0xff]  ;;  %v2033_v10 = vor.u32 %v2202_v5, %v2030_v7  ;;  %v1853_v11 = vor.u32 %v2159_v9, %v1852_v8  ;;  %v2175_v13 = vld [vmem:[#allocation10 + $0x114] sm:$0xf0]  ;;  %v2152_v15 = vld [vmem:[#allocation10 + $0x64] sm:$0xf] }
  0x74   : > { %1187 = vmatpush.bf16.msrb.mxu3 %v1949_v14  ;;  %v1917_v14 = vor.u32 %v2175_v13, %v1916_v12  ;;  %v2200_v17 = vld [vmem:[#allocation10 + $0x1e4] sm:$0xf]  ;;  %v2022_v19 = vld [vmem:[#allocation10 + $0x1e8] sm:$0xf0]  ;;  %v2157_v21 = vld [vmem:[#allocation10 + $0x84] sm:$0xf0] }
  0x75   : > { %v2025_v22 = vor.u32 %v2200_v17, %v2022_v19  ;;  %v1908_v24 = vld [vmem:[#allocation10 + $0x100] sm:$0xf]  ;;  %v2170_v27 = vld [vmem:[#allocation10 + $0xf4] sm:$0xf]  ;;  %v1966_v31 = vld [vmem:[#allocation10 + $0x178] sm:$0xf0] }
  0x76   : > { %1160 = vmatpush.bf16.msrb.mxu1 %v1813_v16  ;;  %v1830_v16 = vld [vmem:[#allocation10 + $0x68] sm:$0xf0]  ;;  %v2186_v29 = vld [vmem:[#allocation10 + $0x174] sm:$0xf]  ;;  %v1822_v34 = vld [vmem:[#allocation10 + $0x58] sm:$0xf0] }
  0x77   : > { %1199 = vmatpush.bf16.msra.mxu0 %v2029_v46  ;;  %1174 = vmatpush.bf16.msrb.mxu2 %v1877_v25  ;;  %v1989_v46 = vor.u32 %v2193_v37, %v1988_v36  ;;  %v1833_v18 = vor.u32 %v2152_v15, %v1830_v16  ;;  %v2173_v25 = vld [vmem:[#allocation10 + $0x104] sm:$0xf0]  ;;  %v2198_v35 = vld [vmem:[#allocation10 + $0x1d4] sm:$0xf]  ;;  %v2014_v36 = vld [vmem:[#allocation10 + $0x1d8] sm:$0xf0] }
  0x78   : > { %1188 = vmatpush.bf16.msrb.mxu3 %v1941_v26  ;;  %v1909_v26 = vor.u32 %v2173_v25, %v1908_v24  ;;  %v2184_v41 = vld [vmem:[#allocation10 + $0x164] sm:$0xf]  ;;  %v1958_v43 = vld [vmem:[#allocation10 + $0x168] sm:$0xf0]  ;;  %v1806_v58 = vld [vmem:[#allocation10 + $0x38] sm:$0xf0] }
  0x79   : > { %v1961_v44 = vor.u32 %v2184_v41, %v1958_v43  ;;  %v2148_v45 = vld [vmem:[#allocation10 + $0x44] sm:$0xf]  ;;  %v2006_v49 = vld [vmem:[#allocation10 + $0x1c8] sm:$0xf0]  ;;  %v2194_v59 = vld [vmem:[#allocation10 + $0x1b4] sm:$0xf] }
  0x7a   : > { %1161 = vmatpush.bf16.msrb.mxu1 %v1805_v28  ;;  %v1902_v28 = vld [vmem:[#allocation10 + $0xf8] sm:$0xf0]  ;;  %v2144_v5 = vld [vmem:[#allocation10 + $0x24] sm:$0xf]  ;;  %v1990_v9 = vld [vmem:[#allocation10 + $0x1a8] sm:$0xf0] }
  0x7b   : > { %1200 = vmatpush.bf16.msra.mxu0 %v2021_v54  ;;  %1175 = vmatpush.bf16.msrb.mxu2 %v1869_v39  ;;  %v1789_v54 = vor.u32 %v2143_v48, %v1788_v47  ;;  %v1905_v30 = vor.u32 %v2170_v27, %v1902_v28  ;;  %v2168_v39 = vld [vmem:[#allocation10 + $0xe4] sm:$0xf]  ;;  %v1998_v61 = vld [vmem:[#allocation10 + $0x1b8] sm:$0xf0]  ;;  %v2178_v13 = vld [vmem:[#allocation10 + $0x134] sm:$0xf] }
  0x7c   : > { %1189 = vmatpush.bf16.msrb.mxu3 %v1933_v40  ;;  %v1894_v40 = vld [vmem:[#allocation10 + $0xe8] sm:$0xf0]  ;;  %v2196_v47 = vld [vmem:[#allocation10 + $0x1c4] sm:$0xf]  ;;  %v1870_v12 = vld [vmem:[#allocation10 + $0xb8] sm:$0xf0] }
  0x7d   : > { %v2009_v50 = vor.u32 %v2196_v47, %v2006_v49  ;;  %v2192_v7 = vld [vmem:[#allocation10 + $0x1a4] sm:$0xf]  ;;  %v1934_v15 = vld [vmem:[#allocation10 + $0x138] sm:$0xf0]  ;;  %v2142_v17 = vld [vmem:[#allocation10 + $0x14] sm:$0xf] }
  0x7e   : > { %1162 = vmatpush.bf16.msrb.mxu1 %v1797_v42  ;;  %v1897_v42 = vor.u32 %v2168_v39, %v1894_v40  ;;  %v1937_v16 = vor.u32 %v2178_v13, %v1934_v15  ;;  %v2190_v19 = vld [vmem:[#allocation10 + $0x194] sm:$0xf]  ;;  %v1926_v27 = vld [vmem:[#allocation10 + $0x128] sm:$0xf0]  ;;  %v2140_v28 = vld [vmem:[#allocation10 + $0x4] sm:$0xf] }
  0x7f   : > { %1201 = vmatpush.bf16.msra.mxu0 %v2013_v6  ;;  %1176 = vmatpush.bf16.msrb.mxu2 %v1861_v51  ;;  %v1841_v6 = vor.u32 %v2154_v3, %v1838_v4  ;;  %v2166_v51 = vld [vmem:[#allocation10 + $0xd4] sm:$0xf]  ;;  %v1942_v3 = vld [vmem:[#allocation10 + $0x148] sm:$0xf0]  ;;  %v529_v41 = vld [vmem:[#allocation8] sm:$0xf] }
  0x80   : > { %1190 = vmatpush.bf16.msrb.mxu3 %v1925_v52  ;;  %v1886_v52 = vld [vmem:[#allocation10 + $0xd8] sm:$0xf0]  ;;  %v2156_v43 = vld [vmem:[#allocation10 + $0x84] sm:$0xf]  ;;  %s1478_s20 = scalar_lea.sflag [#allocation4], %s2787_s18  ;;  %s2535_s1 = sshra.s32 %s1493_s4, 4  ;;  %s2536_s1 = int_to_ptr.hbm [resolvable:$true] %s2535_s1 }
  0x81   : > { %s2537_s17 = scalar_lea.hbm %s2536_s1, 8  ;;  %s2541_s24 = scalar_lea.hbm %s2863_s9, 16 }
  0x82   : > { %1163 = vmatpush.bf16.msrb.mxu1 %v1789_v54  ;;  %v1889_v54 = vor.u32 %v2166_v51, %v1886_v52  ;;  %v534_v51 = vperm.slane %v529_v41, 3  ;;  %p2538_p1 = scmp.ne.s32.totalorder %s2536_s1, %s2537_s17  ;;  %p2542_p12 = scmp.lt.s32.totalorder %s2536_s1, %s2863_s9 }
  0x83   : > { %1202 = vmatpush.bf16.msra.mxu0 %v2005_v20  ;;  %1177 = vmatpush.bf16.msrb.mxu2 %v1853_v11  ;;  %v1844_v20 = vld [vmem:[#allocation10 + $0x80] sm:$0xf]  ;;  %v2162_v11 = vld [vmem:[#allocation10 + $0xb4] sm:$0xf]  ;;  %p2543_p8 = scmp.lt.s32.totalorder %s2541_s24, %s2537_s17 }
  0x84   : > { %1191 = vmatpush.bf16.msrb.mxu3 %v1917_v14  ;;  %v1845_v23 = vor.u32 %v2157_v21, %v1844_v20  ;;  %v1873_v14 = vor.u32 %v2162_v11, %v1870_v12  ;;  %v1982_v21 = vld [vmem:[#allocation10 + $0x198] sm:$0xf0]  ;;  %p2539_p3 = pnand %p2538_p1, %p2753_p13 }
  0x85   : > { %v1985_v24 = vor.u32 %v2190_v19, %v1982_v21  ;;  %v2208_v19 = vld [vmem:[#allocation11 + $0x20] sm:$0xff]  ;;  %v2219_v21 = vld [vmem:[#allocation11 + $0x78] sm:$0xff]  ;;  %p2544_p7 = por %p2543_p8, %p2542_p12 }
  0x86   : > { %1164 = vmatpush.bf16.msrb.mxu1 %v1781_v1  ;;  %v2180_v1 = vld [vmem:[#allocation10 + $0x144] sm:$0xf]  ;;  %p2540_p5 = pneg %p2539_p3 }
  0x87   : > { %1203 = vmatpush.bf16.msra.mxu0 %v1997_v33  ;;  %1178 = vmatpush.bf16.msrb.mxu2 %v1845_v23  ;;  %v1969_v33 = vor.u32 %v2186_v29, %v1966_v31  ;;  %v1945_v4 = vor.u32 %v2180_v1, %v1942_v3  ;;  %v1862_v23 = vld [vmem:[#allocation10 + $0xa8] sm:$0xf0]  ;;  %v2188_v31 = vld [vmem:[#allocation10 + $0x184] sm:$0xf] }
  0x88   : > { %1192 = vmatpush.bf16.msrb.mxu3 %v1909_v26  ;;  %v2176_v26 = vld [vmem:[#allocation10 + $0x124] sm:$0xf]  ;;  %p2545_p9 = pnand %p2544_p7, %p2540_p5 }
  0x89   : > { %v1929_v29 = vor.u32 %v2176_v26, %v1926_v27  ;;  %v2204_v26 = vld [vmem:[#allocation11] sm:$0xff] }
  0x8a   : > { %v2216_v27 = vld [vmem:[#allocation11 + $0x60] sm:$0xff] }
  0x8b   : > { %1204 = vmatpush.bf16.msra.mxu0 %v1989_v46  ;;  %v1814_v46 = vld [vmem:[#allocation10 + $0x48] sm:$0xf0] }
  0x8c   : > { %v1817_v48 = vor.u32 %v2148_v45, %v1814_v46  ;;  %v2172_v45 = vld [vmem:[#allocation10 + $0x104] sm:$0xf] }
  0x8f   : > { %1205 = vmatpush.bf16.msra.mxu0 %v1981_v56 }
  0x93   : > { %1206 = vmatpush.bf16.msra.mxu0 %v1973_v2 }
  0xd3   : > { %v489_v32 = vpop.f32.mrf.mxu0 }
  0xd4   : > { %v490_v53 = vadd.f32 %v2331_v38, %v489_v32  ;;  %v2150_v32 = vld [vmem:[#allocation10 + $0x54] sm:$0xf] }
  0xd5   : > { %v1825_v37 = vor.u32 %v2150_v32, %v1822_v34  ;;  %v1974_v32 = vld [vmem:[#allocation10 + $0x188] sm:$0xf0] }
  0xd6   : > { %v494_v62 = vmax.f32 %v490_v53, 0.0  ;;  %v2182_v53 = vld [vmem:[#allocation10 + $0x154] sm:$0xf]  ;;  %v1977_v34 = vor.u32 %v2188_v31, %v1974_v32  ;;  %v831_v31 = vld [vmem:[%s2860_s6] sm:$0x3]  ;;  %v2213_v32 = vld [vmem:[#allocation11 + $0x48] sm:$0xff] }
  0xdb   : > { %v491_v55 = vpop.f32.mrf.mxu0 }
  0xdc   : > { %v492_v57 = vadd.f32 %v2331_v38, %v491_v55  ;;  %v2017_v38 = vor.u32 %v2198_v35, %v2014_v36  ;;  %v1950_v55 = vld [vmem:[#allocation10 + $0x158] sm:$0xf0]  ;;  %v2158_v35 = vld [vmem:[#allocation10 + $0x94] sm:$0xf] }
  0xdd   : > { %v1953_v56 = vor.u32 %v2182_v53, %v1950_v55  ;;  %v1854_v36 = vld [vmem:[#allocation10 + $0x98] sm:$0xf0] }
  0xde   : > { %v495_v63 = vmax.f32 %v492_v57, 0.0  ;;  %v2146_v57 = vld [vmem:[#allocation10 + $0x34] sm:$0xf]  ;;  %v1857_v39 = vor.u32 %v2158_v35, %v1854_v36  ;;  %v2212_v35 = vld [vmem:[#allocation11 + $0x40] sm:$0xff] }
  0xdf   : > { %v1809_v60 = vor.u32 %v2146_v57, %v1806_v58  ;;  %v532_v57 = vperm.slane %v529_v41, 1 }
  0xe0   : > { %v496_v0 = vpack.c.bf16 %v495_v63, %v494_v62  ;;  %v2001_v62 = vor.u32 %v2194_v59, %v1998_v61  ;;  %v2164_v63 = vld [vmem:[#allocation10 + $0xc4] sm:$0xf] }
  0xe2   : > { %707 = vmatmul.bf16.vlgmr.msra.gmra.mxu1 %v496_v0  ;;  %721 = vmatmul.bf16.vlgmr.msra.gmra.mxu2 %v496_v0 }
  0xe3   : > { %735 = vmatmul.bf16.vlgmr.msra.gmra.mxu3 %v496_v0  ;;  %749 = vmatmul.bf16.vlgmr.msrb.gmra.mxu0 %v496_v0  ;;  %v1878_v0 = vld [vmem:[#allocation10 + $0xc8] sm:$0xf0] }
  0xe4   : > { %1213 = vmatpush.bf16.msra.mxu1 %v1841_v6  ;;  %1255 = vmatpush.bf16.msrb.mxu0 %v2033_v10  ;;  %v1881_v2 = vor.u32 %v2164_v63, %v1878_v0  ;;  %v1798_v6 = vld [vmem:[#allocation10 + $0x28] sm:$0xf0]  ;;  %v1993_v10 = vor.u32 %v2192_v7, %v1990_v9 }
  0xe5   : > { %1227 = vmatpush.bf16.msra.mxu2 %v1905_v30  ;;  %1241 = vmatpush.bf16.msra.mxu3 %v1969_v33  ;;  %v1801_v8 = vor.u32 %v2144_v5, %v1798_v6  ;;  %v1782_v30 = vld [vmem:[#allocation10 + $0x8] sm:$0xf0] }
  0xe6   : > { %v1785_v33 = vor.u32 %v2140_v28, %v1782_v30  ;;  %v2215_v28 = vld [vmem:[#allocation11 + $0x58] sm:$0xff]  ;;  %v2214_v30 = vld [vmem:[#allocation11 + $0x50] sm:$0xff] }
  0xe8   : > { %1214 = vmatpush.bf16.msra.mxu1 %v1833_v18  ;;  %1256 = vmatpush.bf16.msrb.mxu0 %v2025_v22  ;;  %v1790_v18 = vld [vmem:[#allocation10 + $0x18] sm:$0xf0]  ;;  %v2160_v22 = vld [vmem:[#allocation10 + $0xa4] sm:$0xf] }
  0xe9   : > { %1228 = vmatpush.bf16.msra.mxu2 %v1897_v42  ;;  %1242 = vmatpush.bf16.msra.mxu3 %v1961_v44  ;;  %v1793_v20 = vor.u32 %v2142_v17, %v1790_v18  ;;  %v1865_v25 = vor.u32 %v2160_v22, %v1862_v23  ;;  %v1846_v44 = vld [vmem:[#allocation10 + $0x88] sm:$0xf0]  ;;  %v2210_v17 = vld [vmem:[#allocation11 + $0x30] sm:$0xff] }
  0xea   : > { %v1849_v47 = vor.u32 %v2156_v43, %v1846_v44  ;;  %v2209_v18 = vld [vmem:[#allocation11 + $0x28] sm:$0xff]  ;;  %v2206_v22 = vld [vmem:[#allocation11 + $0x10] sm:$0xff] }
  0xeb   : > { %v2218_v23 = vld [vmem:[#allocation11 + $0x70] sm:$0xff] }
  0xec   : > { %1215 = vmatpush.bf16.msra.mxu1 %v1825_v37  ;;  %1257 = vmatpush.bf16.msrb.mxu0 %v2017_v38  ;;  %v2174_v37 = vld [vmem:[#allocation10 + $0x114] sm:$0xf]  ;;  %v1918_v38 = vld [vmem:[#allocation10 + $0x118] sm:$0xf0] }
  0xed   : > { %1229 = vmatpush.bf16.msra.mxu2 %v1889_v54  ;;  %1243 = vmatpush.bf16.msra.mxu3 %v1953_v56  ;;  %v1921_v40 = vor.u32 %v2174_v37, %v1918_v38 }
  0xf0   : > { %1216 = vmatpush.bf16.msra.mxu1 %v1817_v48  ;;  %1258 = vmatpush.bf16.msrb.mxu0 %v2009_v50  ;;  %v1910_v48 = vld [vmem:[#allocation10 + $0x108] sm:$0xf0]  ;;  %v531_v50 = vperm.slane %v529_v41, 0 }
  0xf1   : > { %1230 = vmatpush.bf16.msra.mxu2 %v1881_v2  ;;  %1244 = vmatpush.bf16.msra.mxu3 %v1945_v4  ;;  %v1913_v49 = vor.u32 %v2172_v45, %v1910_v48 }
  0xf4   : > { %1217 = vmatpush.bf16.msra.mxu1 %v1809_v60  ;;  %1259 = vmatpush.bf16.msrb.mxu0 %v2001_v62  ;;  %v533_v60 = vperm.slane %v529_v41, 2 }
  0xf5   : > { %1231 = vmatpush.bf16.msra.mxu2 %v1873_v14  ;;  %1245 = vmatpush.bf16.msra.mxu3 %v1937_v16  ;;  %v2211_v16 = vld [vmem:[#allocation11 + $0x38] sm:$0xff] }
  0xf8   : > { %1218 = vmatpush.bf16.msra.mxu1 %v1801_v8  ;;  %1260 = vmatpush.bf16.msrb.mxu0 %v1993_v10 }
  0xf9   : > { %1232 = vmatpush.bf16.msra.mxu2 %v1865_v25  ;;  %1246 = vmatpush.bf16.msra.mxu3 %v1929_v29  ;;  %v2217_v25 = vld [vmem:[#allocation11 + $0x68] sm:$0xff] }
  0xfc   : > { %1219 = vmatpush.bf16.msra.mxu1 %v1793_v20  ;;  %1261 = vmatpush.bf16.msrb.mxu0 %v1985_v24  ;;  %v2207_v20 = vld [vmem:[#allocation11 + $0x18] sm:$0xff]  ;;  %v2205_v24 = vld [vmem:[#allocation11 + $0x8] sm:$0xff] }
  0xfd   : > { %1233 = vmatpush.bf16.msra.mxu2 %v1857_v39  ;;  %1247 = vmatpush.bf16.msra.mxu3 %v1921_v40 }
 0x100   : > { %1220 = vmatpush.bf16.msra.mxu1 %v1785_v33  ;;  %1262 = vmatpush.bf16.msrb.mxu0 %v1977_v34  ;;  %v833_v33 = vperm.slane %v831_v31, 0 }
 0x101   : > { %1234 = vmatpush.bf16.msra.mxu2 %v1849_v47  ;;  %1248 = vmatpush.bf16.msra.mxu3 %v1913_v49 }
 0x15f   : > { %v708_v42 = vpop.f32.mrf.mxu1 }
 0x160   : > { %v750_v46 = vpop.f32.mrf.mxu0  ;;  %v709_v53 = vadd.f32 %v708_v42, %v531_v50 }
 0x161   : > { %v751_v55 = vadd.f32 %v750_v46, %v534_v51 }
 0x162   : > { %v755_v62 = vmax.f32 %v709_v53, 0.0 }
 0x163   : > { %v758_v0 = vmax.f32 %v751_v55, 0.0 }
 0x165   : > { %v722_v52 = vpop.f32.mrf.mxu2 }
 0x166   : > { %v736_v54 = vpop.f32.mrf.mxu3  ;;  %v723_v2 = vadd.f32 %v722_v52, %v532_v57 }
 0x167   : > { %v710_v56 = vpop.f32.mrf.mxu1  ;;  %v737_v4 = vadd.f32 %v736_v54, %v533_v60 }
 0x168   : > { %v711_v58 = vadd.f32 %v710_v56, %v531_v50  ;;  %v752_v59 = vpop.f32.mrf.mxu0  ;;  %v756_v10 = vmax.f32 %v723_v2, 0.0  ;;  %v834_v50 = vperm.slane %v831_v31, 1 }
 0x169   : > { %v753_v61 = vadd.f32 %v752_v59, %v534_v51  ;;  %v757_v12 = vmax.f32 %v737_v4, 0.0 }
 0x16a   : > { %v759_v63 = vmax.f32 %v711_v58, 0.0 }
 0x16b   : > { %v762_v1 = vmax.f32 %v753_v61, 0.0 }
 0x16c   : > { %v763_v3 = vpack.c.bf16 %v759_v63, %v755_v62 }
 0x16d   : > { %v766_v5 = vpack.c.bf16 %v762_v1, %v758_v0  ;;  %v724_v6 = vpop.f32.mrf.mxu2 }
 0x16e   : > { %v725_v7 = vadd.f32 %v724_v6, %v532_v57  ;;  %v738_v8 = vpop.f32.mrf.mxu3  ;;  %1165 = vmatmul.bf16.vlgmr.msrb.gmra.mxu1 %v763_v3 }
 0x16f   : > { %v739_v9 = vadd.f32 %v738_v8, %v533_v60  ;;  %1207 = vmatmul.bf16.vlgmr.msra.gmra.mxu0 %v766_v5  ;;  %1407 = vmatpush.bf16.msrb.mxu1 %v2211_v16 }
 0x170   : > { %v760_v11 = vmax.f32 %v725_v7, 0.0 }
 0x171   : > { %v761_v13 = vmax.f32 %v739_v9, 0.0 }
 0x172   : > { %v764_v14 = vpack.c.bf16 %v760_v11, %v756_v10  ;;  %v2332_v10 = vld [vmem:[%s2862_s8] ss:$0 sm:$0xff] }
 0x173   : > { %v765_v15 = vpack.c.bf16 %v761_v13, %v757_v12  ;;  %1408 = vmatpush.bf16.msrb.mxu1 %v2210_v17 }
 0x174   : > { %1179 = vmatmul.bf16.vlgmr.msrb.gmra.mxu2 %v764_v14 }
 0x175   : > { %1193 = vmatmul.bf16.vlgmr.msrb.gmra.mxu3 %v765_v15  ;;  %1421 = vmatpush.bf16.msrb.mxu2 %v2219_v21 }
 0x177   : > { %1409 = vmatpush.bf16.msrb.mxu1 %v2209_v18 }
 0x179   : > { %1422 = vmatpush.bf16.msrb.mxu2 %v2218_v23 }
 0x17b   : > { %1410 = vmatpush.bf16.msrb.mxu1 %v2208_v19 }
 0x17d   : > { %1423 = vmatpush.bf16.msrb.mxu2 %v2217_v25 }
 0x17e   : > { %1221 = vmatmul.bf16.vlgmr.msra.gmra.mxu1 %v763_v3 }
 0x17f   : > { %1263 = vmatmul.bf16.vlgmr.msrb.gmra.mxu0 %v766_v5  ;;  %1411 = vmatpush.bf16.msrb.mxu1 %v2207_v20 }
 0x181   : > { %1424 = vmatpush.bf16.msrb.mxu2 %v2216_v27 }
 0x183   : > { %1412 = vmatpush.bf16.msrb.mxu1 %v2206_v22 }
 0x184   : > { %1235 = vmatmul.bf16.vlgmr.msra.gmra.mxu2 %v764_v14 }
 0x185   : > { %1249 = vmatmul.bf16.vlgmr.msra.gmra.mxu3 %v765_v15  ;;  %1425 = vmatpush.bf16.msrb.mxu2 %v2215_v28 }
 0x187   : > { %1413 = vmatpush.bf16.msrb.mxu1 %v2205_v24 }
 0x189   : > { %1426 = vmatpush.bf16.msrb.mxu2 %v2214_v30 }
 0x18b   : > { %1414 = vmatpush.bf16.msrb.mxu1 %v2204_v26 }
 0x18d   : > { %1427 = vmatpush.bf16.msrb.mxu2 %v2213_v32 }
 0x191   : > { %1428 = vmatpush.bf16.msrb.mxu2 %v2212_v35 }
 0x1eb   : > { %v1166_v29 = vpop.f32.mrf.mxu1 }
 0x1ec   : > { %v1208_v34 = vpop.f32.mrf.mxu0  ;;  %v1167_v38 = vadd.f32 %v1166_v29, %v833_v33 }
 0x1f3   : > { %v1168_v36 = vpop.f32.mrf.mxu1 }
 0x1f4   : > { %v1169_v41 = vadd.f32 %v1168_v36, %v833_v33  ;;  %v1210_v43 = vpop.f32.mrf.mxu0 }
 0x1f7   : > { %v1180_v37 = vpop.f32.mrf.mxu2 }
 0x1f8   : > { %v1194_v39 = vpop.f32.mrf.mxu3  ;;  %v1181_v40 = vadd.f32 %v1180_v37, %v1167_v38 }
 0x1fa   : > { %v1195_v42 = vadd.f32 %v1194_v39, %v1181_v40 }
 0x1fb   : > { %v1222_v47 = vpop.f32.mrf.mxu1 }
 0x1fc   : > { %v1209_v48 = vadd.f32 %v1208_v34, %v1195_v42  ;;  %v1223_v55 = vadd.f32 %v1222_v47, %v834_v50  ;;  %v1264_v58 = vpop.f32.mrf.mxu0 }
 0x1fe   : > { %v1269_v52 = vmax.f32 %v1209_v48, 0.0 }
 0x1ff   : > { %v1182_v44 = vpop.f32.mrf.mxu2 }
 0x200   : > { %v1183_v45 = vadd.f32 %v1182_v44, %v1169_v41  ;;  %v1196_v46 = vpop.f32.mrf.mxu3 }
 0x202   : > { %v1197_v49 = vadd.f32 %v1196_v46, %v1183_v45 }
 0x203   : > { %v1224_v60 = vpop.f32.mrf.mxu1 }
 0x204   : > { %v1211_v51 = vadd.f32 %v1210_v43, %v1197_v49  ;;  %v1225_v61 = vadd.f32 %v1224_v60, %v834_v50  ;;  %v1266_v4 = vpop.f32.mrf.mxu0 }
 0x206   : > { %v1271_v53 = vmax.f32 %v1211_v51, 0.0 }
 0x207   : > { %v1236_v54 = vpop.f32.mrf.mxu2 }
 0x208   : > { %v1273_v56 = vpack.c.bf16 %v1271_v53, %v1269_v52  ;;  %v1250_v57 = vpop.f32.mrf.mxu3  ;;  %v1237_v59 = vadd.f32 %v1236_v54, %v1223_v55 }
 0x20a   : > { %1415 = vmatmul.bf16.vlgmr.msrb.gmra.mxu1 %v1273_v56  ;;  %v1251_v62 = vadd.f32 %v1250_v57, %v1237_v59 }
 0x20c   : > { %v1265_v2 = vadd.f32 %v1264_v58, %v1251_v62 }
 0x20e   : > { %v1270_v6 = vmax.f32 %v1265_v2, 0.0 }
 0x20f   : > { %v1238_v63 = vpop.f32.mrf.mxu2 }
 0x210   : > { %v1239_v0 = vadd.f32 %v1238_v63, %v1225_v61  ;;  %v1252_v1 = vpop.f32.mrf.mxu3 }
 0x212   : > { %v1253_v3 = vadd.f32 %v1252_v1, %v1239_v0 }
 0x214   : > { %v1267_v5 = vadd.f32 %v1266_v4, %v1253_v3 }
 0x216   : > { %v1272_v7 = vmax.f32 %v1267_v5, 0.0 }
 0x218   : > { %v1274_v8 = vpack.c.bf16 %v1272_v7, %v1270_v6 }
 0x21a   : > { %1429 = vmatmul.bf16.vlgmr.msrb.gmra.mxu2 %v1274_v8 }
 0x287   : > { %v1416_v9 = vpop.f32.mrf.mxu1 }
 0x288   : > { %v1417_v11 = vadd.f32 %v2332_v10, %v1416_v9 }
 0x28f   : > { %v1418_v15 = vpop.f32.mrf.mxu1 }
 0x290   : > { %v1419_v17 = vadd.f32 %v2332_v10, %v1418_v15 }
 0x29d   : > { %v1430_v12 = vpop.f32.mrf.mxu2 }
 0x29e   : > { %v1431_v13 = vadd.f32 %v1430_v12, %v1417_v11 }
 0x2a0   : > { %v1435_v14 = vsub.f32 0.0, %v1431_v13 }
 0x2a2   : > { %v1437_v16 = vmul.f32 1.442695, %v1435_v14 }
 0x2a4   : > { %2333 = vpow2.f32 %v1437_v16 }
 0x2a5   : > { %v1432_v18 = vpop.f32.mrf.mxu2 }
 0x2a6   : > { %v1433_v19 = vadd.f32 %v1432_v18, %v1419_v17 }
 0x2a8   : > { %v1436_v20 = vsub.f32 0.0, %v1433_v19 }
 0x2aa   : > { %v2334_v21 = vpop.eup %2333  ;;  %v1439_v22 = vmul.f32 1.442695, %v1436_v20 }
 0x2ab   : > { %v1441_v23 = vadd.f32 1.0, %v2334_v21 }
 0x2ac   : > { %2335 = vpow2.f32 %v1439_v22 }
 0x2ad   : > { %2337 = vrcp.f32 %v1441_v23  ;;  %vm1448_vm2 = vweird.f32 %v1441_v23  ;;  %v1454_v34 = vand.u32 2147483648, %v1441_v23  ;;  %v1452_v36 = vand.u32 2147483647, %v1441_v23 }
 0x2af   : > { %v1455_v41 = vor.u32 1.1754944e-38, %v1454_v34  ;;  %vm1453_vm7 = vcmp.eq.f32.partialorder %v1452_v36, 8.507059e+37 }
 0x2b2   : > { %v2336_v24 = vpop.eup %2335 }
 0x2b3   : > { %v2338_v25 = vpop.eup %2337  ;;  %v1442_v26 = vadd.f32 1.0, %v2336_v24 }
 0x2b4   : > { %v1444_v27 = vmul.f32 %v2338_v25, %v1441_v23  ;;  %vm1449_vm1 = vweird.f32 %v2338_v25 }
 0x2b5   : > { %2339 = vrcp.f32 %v1442_v26  ;;  %v1469_v35 = vand.u32 2147483648, %v1442_v26  ;;  %v1467_v38 = vand.u32 2147483647, %v1442_v26  ;;  %vm1450_vm4 = vmor %vm1448_vm2, %vm1449_vm1  ;;  %vm1463_vm5 = vweird.f32 %v1442_v26 }
 0x2b6   : > { %v1445_v28 = vsub.f32 1.0, %v1444_v27 }
 0x2b7   : > { %v1470_v42 = vor.u32 1.1754944e-38, %v1469_v35  ;;  %vm1468_vm8 = vcmp.eq.f32.partialorder %v1467_v38, 8.507059e+37 }
 0x2b8   : > { %v1446_v29 = vmul.f32 %v2338_v25, %v1445_v28 }
 0x2ba   : > { %v1447_v32 = vadd.f32 %v2338_v25, %v1446_v29 }
 0x2bb   : > { %v2340_v30 = vpop.eup %2339 }
 0x2bc   : > { %v1459_v31 = vmul.f32 %v2340_v30, %v1442_v26  ;;  %vm1464_vm3 = vweird.f32 %v2340_v30  ;;  %v1451_v40 = vsel %vm1450_vm4, %v2338_v25, %v1447_v32 }
 0x2bd   : > { %vm1465_vm6 = vmor %vm1463_vm5, %vm1464_vm3  ;;  %v1456_v44 = vsel %vm1453_vm7, %v1455_v41, %v1451_v40 }
 0x2be   : > { %v1460_v33 = vsub.f32 1.0, %v1459_v31 }
 0x2c0   : > { %v1461_v37 = vmul.f32 %v2340_v30, %v1460_v33 }
 0x2c2   : > { %v1462_v39 = vadd.f32 %v2340_v30, %v1461_v37 }
 0x2c4   : > { %v1466_v43 = vsel %vm1465_vm6, %v2340_v30, %v1462_v39 }
 0x2c5   : > { %v1471_v45 = vsel %vm1468_vm8, %v1470_v42, %v1466_v43 }
 0x2c6   : > { %v2224_v46 = vpack.c.bf16 %v1471_v45, %v1456_v44 }
 0x2c8   : > { %2225 = vst [vmem:[%s433_s16] sm:$0xff] %v2224_v46  }
 0x2c9   : > { %2548 = shalt.err (!%p2545_p9)
}
 0x2ca   : > { %s2612_s18 = smov 64   ;;  %s2613_s14 = smov 4  }
 0x2cb   : > { %2248 = dma.vmem_to_hbm [thread:$0]  (%p2753_p13), %s1491_s3, 128, %s1493_s4, %s1478_s20, %s2612_s18, %s2612_s18, %s2613_s14  }
 0x2cc PF: > { %s1507_s21 = sand.u32 1, %s2587_s30   ;;  %p2880_p10 = scmp.ge.s32.totalorder %s2599_s12, 2 }
 0x2cd   : > { %s1508_s13 = scalar_lea.sflag [#allocation4], %s1507_s21 }
 0x2ce   : > { %p2271_p11 = pnand %p2880_p10, %p2758_p4 }
 0x2d0   : > { %p2272_p0 = pneg %p2271_p11 }
 0x2d2   : > { %2582 = dma.done.wait (%p2272_p0), %s1508_s13, 128  }
 0x2d3   : > { %2584 = vsyncadd (%p2272_p0), %s1508_s13, 4294967168  ;;  %p25_p2 = scmp.ge.s32.totalorder %s2733_s27, 4   ;;  %s2881_s30 = smov %s2591_s10 }
 0x2d4   : > { %s2882_s10 = smov %s2595_s11  ;;  %s2883_s11 = smov %s2745_s19 }
 0x2d5   : > { %s2884_s12 = smov %s2733_s27  ;;  %27 = sbr.rel (!%p25_p2) target bundleno = 12 (0xc), region = 121 }
 0x2da   :  { %1514 = vsyncpa [#allocation3], 1 }
 0x2db   :  { %1516 = vsyncpa [#allocation3 + $0x1], 1 }
 0x2dc   :  { %1517 = vsyncpa [#allocation6], 1 }
 0x2dd   :  { %1518 = vsyncpa [#allocation9], 1 }
 0x2de   :  { %1519 = vsyncpa [#allocation12], 1 }
 0x2df   :  { %1520 = vsyncpa [#allocation4], 1 }
 0x2e0   :  { %1522 = vsyncpa [#allocation4 + $0x1], 1 }

</bundles_post_ra>
